<compile_context>
chip_gen: v7x
topology: tpu7x:2x2x1
jax: 0.10.0
libtpu: 0.0.40
codegen_flags: <defaults>
</compile_context>

<pallas_src>
import jax
import jax.numpy as jnp
from jax.experimental import pallas as pl
from jax.experimental.pallas import tpu as pltpu


def _pos_emb_kernel(w_ref, o_ref):
    # w_ref: (1, S*D) weight slab (VMEM-resident, constant across the grid).
    # o_ref: (TB, S*D) output tile for this batch tile.
    o_ref[...] = jnp.broadcast_to(w_ref[...], o_ref.shape)


def positional_embedding(tokens: jax.Array, weight: jax.Array, *, tb: int | None = None) -> jax.Array:
    """Pallas implementation of PositionalEmbedding.forward.

    tokens: (B, ...) int array -- only the leading batch dim is used.
    weight: (S, D) embedding table.
    returns: (B, S, D) array of weight.dtype.
    """
    b = tokens.shape[0]
    s, d = weight.shape
    sd = s * d
    itemsize = jnp.dtype(weight.dtype).itemsize

    # Lane-dense flattening (pure reshape, no data movement).
    w_flat = weight.reshape(1, sd)

    # Pick a batch tile: ~4 MiB output tile per buffer.  With double buffering
    # (2 x 4 MiB) plus the single resident weight slab this fits comfortably
    # under the scoped-VMEM defaults (v5e 16 MiB, v6e/v7x 32 MiB).
    if tb is None:
        rows_4mib = max(8, (4 * 1024 * 1024) // max(sd * itemsize, 1))
        tb = max(8, (rows_4mib // 8) * 8)
        # Keep >= 2 grid steps when the batch is big enough so v7x can split
        # the writeback across its two TensorCores.
        if b >= 16:
            tb = min(tb, max(8, (((b + 1) // 2) // 8) * 8))
    if tb >= b:
        tb = b  # full batch extent -> always a legal block shape
    else:
        tb = max(8, (tb // 8) * 8)  # sublane-aligned partial tile

    grid = (pl.cdiv(b, tb),)

    out_flat = pl.pallas_call(
        _pos_emb_kernel,
        out_shape=jax.ShapeDtypeStruct((b, sd), weight.dtype),
        grid_spec=pltpu.PrefetchScalarGridSpec(
            num_scalar_prefetch=0,
            grid=grid,
            in_specs=[
                # Constant block index: the table is fetched from HBM once and
                # stays resident in VMEM for every grid step.
                pl.BlockSpec((1, sd), lambda i: (0, 0)),
            ],
            out_specs=pl.BlockSpec((tb, sd), lambda i: (i, 0)),
        ),
        compiler_params=pltpu.CompilerParams(
            dimension_semantics=("parallel",),
        ),
        cost_estimate=pl.CostEstimate(
            flops=0,
            transcendentals=0,
            bytes_accessed=b * sd * itemsize + sd * itemsize,
        ),
    )(w_flat)

    return out_flat.reshape(b, s, d)


if __name__ == "__main__":
    # Module config (consistent with __init__ defaults).
    sequence_len = 8
    embedding_dim = 64
    batch = 2

    key = jax.random.PRNGKey(0)
    k_w, k_t = jax.random.split(key)

    # nn.Embedding initializes weight ~ N(0, 1): deterministic synthetic init.
    weight = jax.random.normal(k_w, (sequence_len, embedding_dim), dtype=jnp.float32)

    # tokens are LongTensor in PyTorch; values are unused by forward.
    tokens = jax.random.randint(
        k_t, (batch, sequence_len), minval=0, maxval=sequence_len, dtype=jnp.int32
    )

    out = positional_embedding(tokens, weight)
    out = jax.block_until_ready(out)

    # Reference check: weight broadcast over batch.
    ref = jnp.broadcast_to(weight[None, :, :], (batch, sequence_len, embedding_dim))
    assert out.shape == (batch, sequence_len, embedding_dim)
    assert out.dtype == jnp.float32
    assert bool(jnp.allclose(out, ref)), "Pallas output mismatch vs reference"

    print("KERNEL_OK")
</pallas_src>

<mosaic_0001>
module attributes {stable_mosaic.version = 11 : i64} {
  func.func @_pos_emb_kernel(%arg0: i32, %arg1: memref<1x512xf32, #tpu.memory_space<vmem>>, %arg2: memref<2x512xf32, #tpu.memory_space<vmem>>) attributes {dimension_semantics = [#tpu.dimension_semantics<parallel>], iteration_bounds = array<i64: 1>, scalar_prefetch = 0 : i64, scratch_operands = 0 : i64, tpu.core_type = #tpu.core_type<tc>, window_params = [{pipeline_mode = #tpu.pipeline_mode<synchronous>, transform_indices = @transform_0, window_bounds = array<i64: 1, 512>}, {transform_indices = @transform_1, window_bounds = array<i64: 2, 512>}]} {
    %c0 = arith.constant 0 : index
    %c0_0 = arith.constant 0 : index
    %0 = vector.load %arg1[%c0, %c0_0] : memref<1x512xf32, #tpu.memory_space<vmem>>, vector<1x512xf32>
    %1 = vector.shape_cast %0 : vector<1x512xf32> to vector<1x512xf32>
    %2 = vector.broadcast %1 : vector<1x512xf32> to vector<2x512xf32>
    %c0_1 = arith.constant 0 : index
    %c0_2 = arith.constant 0 : index
    %3 = vector.load %arg2[%c0_1, %c0_2] : memref<2x512xf32, #tpu.memory_space<vmem>>, vector<2x512xf32>
    tpu.vector_store %arg2[%c0_1, %c0_2], %2 {strides = array<i32>} : memref<2x512xf32, #tpu.memory_space<vmem>>, vector<2x512xf32>,
    return
  }
  func.func @transform_0(%arg0: i32) -> (i32, i32) {
    %c0_i32 = arith.constant 0 : i32
    %c0_i32_0 = arith.constant 0 : i32
    %c0_i32_1 = arith.constant 0 : i32
    return %c0_i32, %c0_i32_0 : i32, i32
  }
  func.func @transform_1(%arg0: i32) -> (i32, i32) {
    %c0_i32 = arith.constant 0 : i32
    %c0_i32_0 = arith.constant 0 : i32
    return %arg0, %c0_i32 : i32, i32
  }
}

</mosaic_0001>

<bundles_post_ra>
// kernel: tpu_custom_call.1
= control target key start
LH: loop header
LB: loop body
LE: loop exit
PB: predicated region body
PF: predicated region fallthrough
CT: control target
= control target key end

     0   :  { %6 = vsyncpa [#allocation3], 0  ;;  %s161_s0 = inlined_call_operand.hbm [shape: f32[1,512], index: 0, kind: input, shape index: {}]   ;;  %s162_s1 = inlined_call_operand.hbm [shape: f32[2,512], index: 1, kind: output, shape index: {}]  }
   0x1   :  { %7 = vsyncpa [#allocation4], 0  ;;  %s124_s6 = smov [#allocation2]   ;;  %s76_s10 = scalar_lea.hbm %s161_s0, 64 }
   0x2   :  { %s14_s7 = sshll.u32 %s124_s6, 4  ;;  %p77_p0 = scmp.ne.s32.totalorder %s161_s0, %s76_s10  ;;  %s15_s7 = int_to_ptr.vmem [resolvable:$true] %s14_s7 }
   0x3   :  { %p80_p1 = scmp.lt.u32.totalorder %s76_s10, %s161_s0 }
   0x5   :  { %p82_p2 = pnand %p80_p1, %p77_p0 }
   0x7   :  { %85 = shalt.err (!%p82_p2)
}
   0x8   :  { %s86_s15 = scalar_lea.vmem %s15_s7, 64  ;;  %p91_p4 = scmp.lt.s32.totalorder %s15_s7, %s15_s7 }
   0x9   :  { %p87_p3 = scmp.ne.s32.totalorder %s15_s7, %s86_s15  ;;  %p92_p5 = scmp.lt.s32.totalorder %s86_s15, %s86_s15 }
   0xb   :  { %p93_p6 = por %p92_p5, %p91_p4 }
   0xd   :  { %p94_p7 = pnand %p93_p6, %p87_p3 }
   0xf   :  { %97 = shalt.err (!%p94_p7)
}
  0x10   :  { %17 = dma.hbm_to_vmem [thread:$0]  %s161_s0, 64, %s15_s7, [#allocation3]  }
  0x11   :  { %120 = dma.done.wait [#allocation3], 64  }
  0x12   :  { %121 = vsyncadd [#allocation3], 4294967232  ;;  %v23_v0 = vlaneseq  ;;  %v125_v1 = vmov 1983009808   ;;  %v21_v9 = vld [vmem:[#allocation2] sm:$0xf] }
  0x13   :  { %v42_v2 = vunpack.c.l.s4 %v125_v1  ;;  %s126_s0 = smov [#allocation5]  }
  0x14   :  { %v24_v3 = vshrl.u32 %v23_v0, 7  ;;  %s64_s18 = sshll.u32 %s126_s0, 4  ;;  %s65_s18 = int_to_ptr.vmem [resolvable:$true] %s64_s18 }
  0x15   :  { %v43_v4 = vunpack.c.0.s8 %v42_v2  ;;  %s98_s19 = scalar_lea.vmem %s65_s18, 128  ;;  %p103_p9 = scmp.lt.s32.totalorder %s65_s18, %s65_s18 }
  0x16   :  { %v25_v5 = vsub.s32 0, %v24_v3  ;;  %v29_v6 = vsub.s32 1, %v24_v3  ;;  %v33_v7 = vsub.s32 2, %v24_v3  ;;  %v37_v8 = vsub.s32 3, %v24_v3  ;;  %p99_p8 = scmp.ne.s32.totalorder %s65_s18, %s98_s19  ;;  %p104_p10 = scmp.lt.s32.totalorder %s98_s19, %s98_s19 }
  0x17   :  { %v46_v10 = vsub.s32 %v43_v4, %v24_v3 }
  0x18   :  { %v26_v11 = vrot.slane %v21_v9, %v25_v5  ;;  %v30_v12 = vrot.slane %v21_v9, %v29_v6  ;;  %v34_v13 = vrot.slane %v21_v9, %v33_v7  ;;  %v38_v14 = vrot.slane %v21_v9, %v37_v8  ;;  %p105_p11 = por %p104_p10, %p103_p9 }
  0x1a   :  { %v39_v15 = vcombine.low %v26_v11, %v30_v12  ;;  %v40_v16 = vcombine.low %v34_v13, %v38_v14  ;;  %p106_p12 = pnand %p105_p11, %p99_p8 }
  0x1c   :  { %v47_v17 = vrot.slane %v39_v15, %v46_v10  ;;  %v54_v18 = vrot.slane %v40_v16, %v46_v10 }
  0x1e   :  { %v55_v19 = vcombine.low %v47_v17, %v54_v18 }
  0x20   :  { %57 = vst [vmem:[#allocation5] sm:$0xff] %v55_v19 }
  0x21   :  { %109 = shalt.err (!%p106_p12)
}
  0x22   :  { %s110_s22 = scalar_lea.hbm %s162_s1, 128 }
  0x23   :  { %p111_p13 = scmp.ne.s32.totalorder %s162_s1, %s110_s22  ;;  %p114_p0 = scmp.lt.u32.totalorder %s110_s22, %s162_s1 }
  0x25   :  { %p116_p1 = pnand %p114_p0, %p111_p13 }
  0x27   :  { %119 = shalt.err (!%p116_p1)
}
  0x28   :  { %67 = dma.vmem_to_hbm [thread:$0]  %s65_s18, 128, %s162_s1, [#allocation4]  }
  0x29   :  { %122 = dma.done.wait [#allocation4], 128  }
  0x2a   :  { %123 = vsyncadd [#allocation4], 4294967168 }
  0x2b   :  { %71 = vsyncpa [#allocation3], 1 }
  0x2c   :  { %72 = vsyncpa [#allocation4], 1 }

</bundles_post_ra>
